<compile_context>
chip_gen: v6e
topology: v6e:2x2x1
jax: 0.10.0
libtpu: 0.0.40
codegen_flags: <defaults>
</compile_context>

<pallas_src>
import jax
import jax.numpy as jnp
from jax.experimental import pallas as pl
from jax.experimental.pallas import tpu as pltpu

BN_EPS = 1e-3
LANE = 128


def _round_up(n: int, m: int) -> int:
    return ((n + m - 1) // m) * m


def encoder_kernel(x_ref, *refs):
    """refs = (w1, g1, be1, ..., w5, g5, be5, out_ref).

    x_ref: [B, D0p] f32, w: [Din_p, Dout_p] bf16 (pre-transposed), g/be: [1, Dout_p] f32.
    """
    out_ref = refs[-1]
    param_refs = refs[:-1]

    h = x_ref[...]                       # f32 [B, D]
    inv_b = 1.0 / h.shape[0]             # static batch size

    for li in range(5):
        w = param_refs[3 * li + 0][...]      # bf16 [Din_p, Dout_p]
        g = param_refs[3 * li + 1][...]      # f32  [1, Dout_p]
        be = param_refs[3 * li + 2][...]     # f32  [1, Dout_p]

        # Linear (bias omitted: exactly cancelled by the batch-mean subtraction below).
        y = jnp.dot(h.astype(jnp.bfloat16), w, preferred_element_type=jnp.float32)

        # BatchNorm1d (training mode): batch mean + biased variance per feature.
        # Single reduction pass: var = E[y^2] - mean^2 (clamped; eps=1e-3, f32 accum).
        # Small batch here -> jnp.sum on the sublane axis is cheap; for large B switch
        # to a ones[1,B] @ [y, y*y] MXU reduction.
        mean = jnp.sum(y, axis=0, keepdims=True) * inv_b          # [1, Dout]
        mean_sq = jnp.sum(y * y, axis=0, keepdims=True) * inv_b   # [1, Dout]
        var = jnp.maximum(mean_sq - mean * mean, 0.0)

        # Fold BN into per-feature scale/shift, then one fused normalize+ReLU pass.
        scale = jax.lax.rsqrt(var + BN_EPS) * g                   # [1, Dout]
        shift = be - mean * scale                                 # [1, Dout]
        h = jnp.maximum(y * scale + shift, 0.0)

    out_ref[...] = h.astype(out_ref.dtype)


def encoder_forward(x, params):
    """x: [B, input_dim] f32.  params: list of 5 tuples (w[out,in], b[out], gamma[out], beta[out])."""
    B, input_dim = x.shape
    latent_dim = params[-1][0].shape[0]   # last layer weight: [latent_dim, fc_units]

    # --- wrapper-side layout plumbing: pad feature dims to 128 lanes, transpose weights ---
    din_p = _round_up(input_dim, LANE)
    x_p = jnp.pad(x.astype(jnp.float32), ((0, 0), (0, din_p - input_dim)))

    flat = []
    prev_p = din_p
    for (w, b, g, be) in params:
        dout, din = w.shape
        dout_p = _round_up(dout, LANE)
        # Pre-transposed, zero-padded bf16 weight [Din_p, Dout_p].
        w_t = jnp.zeros((prev_p, dout_p), jnp.bfloat16)
        w_t = w_t.at[:din, :dout].set(w.T.astype(jnp.bfloat16))
        # Bias b is intentionally not passed to the kernel (cancelled by BN mean-subtract).
        g_p = jnp.ones((1, dout_p), jnp.float32).at[0, :dout].set(g.astype(jnp.float32))
        be_p = jnp.zeros((1, dout_p), jnp.float32).at[0, :dout].set(be.astype(jnp.float32))
        flat += [w_t, g_p, be_p]
        prev_p = dout_p
    latent_p = prev_p

    # --- VMEM budget: inputs + params + output + activation temporaries, with headroom ---
    max_width = max(din_p, latent_p, *(p.shape[1] for p in flat))
    param_bytes = sum(int(p.size) * p.dtype.itemsize for p in flat)
    act_bytes = 4 * B * max_width
    needed = x_p.size * 4 + param_bytes + B * latent_p * 4 + 8 * act_bytes
    vmem_limit = int(min(max(2 * needed, 16 * 1024 * 1024), 64 * 1024 * 1024))

    vmem_spec = pl.BlockSpec(memory_space=pltpu.MemorySpace.VMEM)
    out_p = pl.pallas_call(
        encoder_kernel,
        out_shape=jax.ShapeDtypeStruct((B, latent_p), jnp.float32),
        in_specs=[vmem_spec] * (1 + len(flat)),
        out_specs=vmem_spec,
        compiler_params=pltpu.CompilerParams(vmem_limit_bytes=vmem_limit),
    )(x_p, *flat)

    return out_p[:, :latent_dim]


def init_params(key, input_dim, fc_units, latent_dim):
    """PyTorch-style params: Linear weight [out, in], bias [out]; BN gamma=1, beta=0."""
    dims = [(input_dim, fc_units), (fc_units, fc_units), (fc_units, fc_units),
            (fc_units, fc_units), (fc_units, latent_dim)]
    params = []
    for i, (din, dout) in enumerate(dims):
        kw, kb = jax.random.split(jax.random.fold_in(key, i))
        bound = 1.0 / (din ** 0.5)
        w = jax.random.uniform(kw, (dout, din), jnp.float32, -bound, bound)
        b = jax.random.uniform(kb, (dout,), jnp.float32, -bound, bound)
        gamma = jnp.ones((dout,), jnp.float32)
        beta = jnp.zeros((dout,), jnp.float32)
        params.append((w, b, gamma, beta))
    return params


def reference_forward(x, params):
    """Pure-JAX reference mirroring the kernel's numerics (bf16 MXU inputs, f32 accum/BN).

    Note: the Linear bias is omitted because training-mode BN's batch-mean subtraction
    cancels it exactly; aside from bf16 rounding of the matmul inputs this is numerically
    equivalent to the f32 PyTorch forward.
    """
    h = x.astype(jnp.float32)
    for (w, b, g, be) in params:
        y = jnp.dot(h.astype(jnp.bfloat16), w.T.astype(jnp.bfloat16),
                    preferred_element_type=jnp.float32)
        mean = jnp.mean(y, axis=0, keepdims=True)
        var = jnp.maximum(jnp.mean(y * y, axis=0, keepdims=True) - mean * mean, 0.0)
        h = jnp.maximum((y - mean) * jax.lax.rsqrt(var + BN_EPS) * g[None, :] + be[None, :], 0.0)
    return h


if __name__ == "__main__":
    input_dim, fc_units, latent_dim = 16, 32, 8
    batch = 8

    key = jax.random.PRNGKey(0)
    kx, kp = jax.random.split(key)
    x = jax.random.normal(kx, (batch, input_dim), jnp.float32)
    params = init_params(kp, input_dim, fc_units, latent_dim)

    out = encoder_forward(x, params)
    out = jax.block_until_ready(out)

    ref = reference_forward(x, params)
    assert out.shape == (batch, latent_dim), out.shape
    assert jnp.allclose(out, ref, atol=2e-3, rtol=2e-3), (
        "mismatch vs reference: max abs diff = %g" % float(jnp.max(jnp.abs(out - ref))))

    print("KERNEL_OK")
</pallas_src>

<mosaic_0001>
module attributes {stable_mosaic.version = 11 : i64} {
  func.func @encoder_kernel(%arg0: memref<8x128xf32, #tpu.memory_space<vmem>>, %arg1: memref<128x128xbf16, #tpu.memory_space<vmem>>, %arg2: memref<1x128xf32, #tpu.memory_space<vmem>>, %arg3: memref<1x128xf32, #tpu.memory_space<vmem>>, %arg4: memref<128x128xbf16, #tpu.memory_space<vmem>>, %arg5: memref<1x128xf32, #tpu.memory_space<vmem>>, %arg6: memref<1x128xf32, #tpu.memory_space<vmem>>, %arg7: memref<128x128xbf16, #tpu.memory_space<vmem>>, %arg8: memref<1x128xf32, #tpu.memory_space<vmem>>, %arg9: memref<1x128xf32, #tpu.memory_space<vmem>>, %arg10: memref<128x128xbf16, #tpu.memory_space<vmem>>, %arg11: memref<1x128xf32, #tpu.memory_space<vmem>>, %arg12: memref<1x128xf32, #tpu.memory_space<vmem>>, %arg13: memref<128x128xbf16, #tpu.memory_space<vmem>>, %arg14: memref<1x128xf32, #tpu.memory_space<vmem>>, %arg15: memref<1x128xf32, #tpu.memory_space<vmem>>, %arg16: memref<8x128xf32, #tpu.memory_space<vmem>>) attributes {dimension_semantics = [], scalar_prefetch = 0 : i64, scratch_operands = 0 : i64, tpu.core_type = #tpu.core_type<tc>} {
    %c0 = arith.constant 0 : index
    %c0_0 = arith.constant 0 : index
    %0 = vector.load %arg0[%c0, %c0_0] : memref<8x128xf32, #tpu.memory_space<vmem>>, vector<8x128xf32>
    %c0_1 = arith.constant 0 : index
    %c0_2 = arith.constant 0 : index
    %1 = vector.load %arg1[%c0_1, %c0_2] : memref<128x128xbf16, #tpu.memory_space<vmem>>, vector<128x128xbf16>
    %c0_3 = arith.constant 0 : index
    %c0_4 = arith.constant 0 : index
    %2 = vector.load %arg2[%c0_3, %c0_4] : memref<1x128xf32, #tpu.memory_space<vmem>>, vector<1x128xf32>
    %c0_5 = arith.constant 0 : index
    %c0_6 = arith.constant 0 : index
    %3 = vector.load %arg3[%c0_5, %c0_6] : memref<1x128xf32, #tpu.memory_space<vmem>>, vector<1x128xf32>
    %4 = arith.truncf %0 : vector<8x128xf32> to vector<8x128xbf16>
    %cst = arith.constant dense<0.000000e+00> : vector<8x128xf32>
    %5 = tpu.matmul %4, %1, %cst {dimension_numbers = #tpu.dot_dimension_numbers<[1], [0], [0], [1], [0, 0, 1, 1], [], []>} : vector<8x128xbf16>, vector<128x128xbf16>, vector<8x128xf32> -> vector<8x128xf32>
    %cst_7 = arith.constant dense<0.000000e+00> : vector<128xf32>
    %6 = vector.multi_reduction <add>, %5, %cst_7 [0] : vector<8x128xf32> to vector<128xf32>
    %7 = vector.shape_cast %6 : vector<128xf32> to vector<1x128xf32>
    %cst_8 = arith.constant 1.250000e-01 : f32
    %8 = vector.broadcast %cst_8 : f32 to vector<1x128xf32>
    %9 = arith.mulf %7, %8 : vector<1x128xf32>
    %10 = arith.mulf %5, %5 : vector<8x128xf32>
    %cst_9 = arith.constant dense<0.000000e+00> : vector<128xf32>
    %11 = vector.multi_reduction <add>, %10, %cst_9 [0] : vector<8x128xf32> to vector<128xf32>
    %12 = vector.shape_cast %11 : vector<128xf32> to vector<1x128xf32>
    %cst_10 = arith.constant 1.250000e-01 : f32
    %13 = vector.broadcast %cst_10 : f32 to vector<1x128xf32>
    %14 = arith.mulf %12, %13 : vector<1x128xf32>
    %15 = arith.mulf %9, %9 : vector<1x128xf32>
    %16 = arith.subf %14, %15 : vector<1x128xf32>
    %cst_11 = arith.constant 0.000000e+00 : f32
    %17 = vector.broadcast %cst_11 : f32 to vector<1x128xf32>
    %18 = arith.maximumf %16, %17 : vector<1x128xf32>
    %cst_12 = arith.constant 1.000000e-03 : f32
    %19 = vector.broadcast %cst_12 : f32 to vector<1x128xf32>
    %20 = arith.addf %18, %19 : vector<1x128xf32>
    %21 = math.rsqrt %20 : vector<1x128xf32>
    %22 = arith.mulf %21, %2 : vector<1x128xf32>
    %23 = arith.mulf %9, %22 : vector<1x128xf32>
    %24 = arith.subf %3, %23 : vector<1x128xf32>
    %25 = vector.broadcast %22 : vector<1x128xf32> to vector<8x128xf32>
    %26 = arith.mulf %5, %25 : vector<8x128xf32>
    %27 = vector.broadcast %24 : vector<1x128xf32> to vector<8x128xf32>
    %28 = arith.addf %26, %27 : vector<8x128xf32>
    %cst_13 = arith.constant 0.000000e+00 : f32
    %29 = vector.broadcast %cst_13 : f32 to vector<8x128xf32>
    %30 = arith.maximumf %28, %29 : vector<8x128xf32>
    %c0_14 = arith.constant 0 : index
    %c0_15 = arith.constant 0 : index
    %31 = vector.load %arg4[%c0_14, %c0_15] : memref<128x128xbf16, #tpu.memory_space<vmem>>, vector<128x128xbf16>
    %c0_16 = arith.constant 0 : index
    %c0_17 = arith.constant 0 : index
    %32 = vector.load %arg5[%c0_16, %c0_17] : memref<1x128xf32, #tpu.memory_space<vmem>>, vector<1x128xf32>
    %c0_18 = arith.constant 0 : index
    %c0_19 = arith.constant 0 : index
    %33 = vector.load %arg6[%c0_18, %c0_19] : memref<1x128xf32, #tpu.memory_space<vmem>>, vector<1x128xf32>
    %34 = arith.truncf %30 : vector<8x128xf32> to vector<8x128xbf16>
    %cst_20 = arith.constant dense<0.000000e+00> : vector<8x128xf32>
    %35 = tpu.matmul %34, %31, %cst_20 {dimension_numbers = #tpu.dot_dimension_numbers<[1], [0], [0], [1], [0, 0, 1, 1], [], []>} : vector<8x128xbf16>, vector<128x128xbf16>, vector<8x128xf32> -> vector<8x128xf32>
    %cst_21 = arith.constant dense<0.000000e+00> : vector<128xf32>
    %36 = vector.multi_reduction <add>, %35, %cst_21 [0] : vector<8x128xf32> to vector<128xf32>
    %37 = vector.shape_cast %36 : vector<128xf32> to vector<1x128xf32>
    %cst_22 = arith.constant 1.250000e-01 : f32
    %38 = vector.broadcast %cst_22 : f32 to vector<1x128xf32>
    %39 = arith.mulf %37, %38 : vector<1x128xf32>
    %40 = arith.mulf %35, %35 : vector<8x128xf32>
    %cst_23 = arith.constant dense<0.000000e+00> : vector<128xf32>
    %41 = vector.multi_reduction <add>, %40, %cst_23 [0] : vector<8x128xf32> to vector<128xf32>
    %42 = vector.shape_cast %41 : vector<128xf32> to vector<1x128xf32>
    %cst_24 = arith.constant 1.250000e-01 : f32
    %43 = vector.broadcast %cst_24 : f32 to vector<1x128xf32>
    %44 = arith.mulf %42, %43 : vector<1x128xf32>
    %45 = arith.mulf %39, %39 : vector<1x128xf32>
    %46 = arith.subf %44, %45 : vector<1x128xf32>
    %cst_25 = arith.constant 0.000000e+00 : f32
    %47 = vector.broadcast %cst_25 : f32 to vector<1x128xf32>
    %48 = arith.maximumf %46, %47 : vector<1x128xf32>
    %cst_26 = arith.constant 1.000000e-03 : f32
    %49 = vector.broadcast %cst_26 : f32 to vector<1x128xf32>
    %50 = arith.addf %48, %49 : vector<1x128xf32>
    %51 = math.rsqrt %50 : vector<1x128xf32>
    %52 = arith.mulf %51, %32 : vector<1x128xf32>
    %53 = arith.mulf %39, %52 : vector<1x128xf32>
    %54 = arith.subf %33, %53 : vector<1x128xf32>
    %55 = vector.broadcast %52 : vector<1x128xf32> to vector<8x128xf32>
    %56 = arith.mulf %35, %55 : vector<8x128xf32>
    %57 = vector.broadcast %54 : vector<1x128xf32> to vector<8x128xf32>
    %58 = arith.addf %56, %57 : vector<8x128xf32>
    %cst_27 = arith.constant 0.000000e+00 : f32
    %59 = vector.broadcast %cst_27 : f32 to vector<8x128xf32>
    %60 = arith.maximumf %58, %59 : vector<8x128xf32>
    %c0_28 = arith.constant 0 : index
    %c0_29 = arith.constant 0 : index
    %61 = vector.load %arg7[%c0_28, %c0_29] : memref<128x128xbf16, #tpu.memory_space<vmem>>, vector<128x128xbf16>
    %c0_30 = arith.constant 0 : index
    %c0_31 = arith.constant 0 : index
    %62 = vector.load %arg8[%c0_30, %c0_31] : memref<1x128xf32, #tpu.memory_space<vmem>>, vector<1x128xf32>
    %c0_32 = arith.constant 0 : index
    %c0_33 = arith.constant 0 : index
    %63 = vector.load %arg9[%c0_32, %c0_33] : memref<1x128xf32, #tpu.memory_space<vmem>>, vector<1x128xf32>
    %64 = arith.truncf %60 : vector<8x128xf32> to vector<8x128xbf16>
    %cst_34 = arith.constant dense<0.000000e+00> : vector<8x128xf32>
    %65 = tpu.matmul %64, %61, %cst_34 {dimension_numbers = #tpu.dot_dimension_numbers<[1], [0], [0], [1], [0, 0, 1, 1], [], []>} : vector<8x128xbf16>, vector<128x128xbf16>, vector<8x128xf32> -> vector<8x128xf32>
    %cst_35 = arith.constant dense<0.000000e+00> : vector<128xf32>
    %66 = vector.multi_reduction <add>, %65, %cst_35 [0] : vector<8x128xf32> to vector<128xf32>
    %67 = vector.shape_cast %66 : vector<128xf32> to vector<1x128xf32>
    %cst_36 = arith.constant 1.250000e-01 : f32
    %68 = vector.broadcast %cst_36 : f32 to vector<1x128xf32>
    %69 = arith.mulf %67, %68 : vector<1x128xf32>
    %70 = arith.mulf %65, %65 : vector<8x128xf32>
    %cst_37 = arith.constant dense<0.000000e+00> : vector<128xf32>
    %71 = vector.multi_reduction <add>, %70, %cst_37 [0] : vector<8x128xf32> to vector<128xf32>
    %72 = vector.shape_cast %71 : vector<128xf32> to vector<1x128xf32>
    %cst_38 = arith.constant 1.250000e-01 : f32
    %73 = vector.broadcast %cst_38 : f32 to vector<1x128xf32>
    %74 = arith.mulf %72, %73 : vector<1x128xf32>
    %75 = arith.mulf %69, %69 : vector<1x128xf32>
    %76 = arith.subf %74, %75 : vector<1x128xf32>
    %cst_39 = arith.constant 0.000000e+00 : f32
    %77 = vector.broadcast %cst_39 : f32 to vector<1x128xf32>
    %78 = arith.maximumf %76, %77 : vector<1x128xf32>
    %cst_40 = arith.constant 1.000000e-03 : f32
    %79 = vector.broadcast %cst_40 : f32 to vector<1x128xf32>
    %80 = arith.addf %78, %79 : vector<1x128xf32>
    %81 = math.rsqrt %80 : vector<1x128xf32>
    %82 = arith.mulf %81, %62 : vector<1x128xf32>
    %83 = arith.mulf %69, %82 : vector<1x128xf32>
    %84 = arith.subf %63, %83 : vector<1x128xf32>
    %85 = vector.broadcast %82 : vector<1x128xf32> to vector<8x128xf32>
    %86 = arith.mulf %65, %85 : vector<8x128xf32>
    %87 = vector.broadcast %84 : vector<1x128xf32> to vector<8x128xf32>
    %88 = arith.addf %86, %87 : vector<8x128xf32>
    %cst_41 = arith.constant 0.000000e+00 : f32
    %89 = vector.broadcast %cst_41 : f32 to vector<8x128xf32>
    %90 = arith.maximumf %88, %89 : vector<8x128xf32>
    %c0_42 = arith.constant 0 : index
    %c0_43 = arith.constant 0 : index
    %91 = vector.load %arg10[%c0_42, %c0_43] : memref<128x128xbf16, #tpu.memory_space<vmem>>, vector<128x128xbf16>
    %c0_44 = arith.constant 0 : index
    %c0_45 = arith.constant 0 : index
    %92 = vector.load %arg11[%c0_44, %c0_45] : memref<1x128xf32, #tpu.memory_space<vmem>>, vector<1x128xf32>
    %c0_46 = arith.constant 0 : index
    %c0_47 = arith.constant 0 : index
    %93 = vector.load %arg12[%c0_46, %c0_47] : memref<1x128xf32, #tpu.memory_space<vmem>>, vector<1x128xf32>
    %94 = arith.truncf %90 : vector<8x128xf32> to vector<8x128xbf16>
    %cst_48 = arith.constant dense<0.000000e+00> : vector<8x128xf32>
    %95 = tpu.matmul %94, %91, %cst_48 {dimension_numbers = #tpu.dot_dimension_numbers<[1], [0], [0], [1], [0, 0, 1, 1], [], []>} : vector<8x128xbf16>, vector<128x128xbf16>, vector<8x128xf32> -> vector<8x128xf32>
    %cst_49 = arith.constant dense<0.000000e+00> : vector<128xf32>
    %96 = vector.multi_reduction <add>, %95, %cst_49 [0] : vector<8x128xf32> to vector<128xf32>
    %97 = vector.shape_cast %96 : vector<128xf32> to vector<1x128xf32>
    %cst_50 = arith.constant 1.250000e-01 : f32
    %98 = vector.broadcast %cst_50 : f32 to vector<1x128xf32>
    %99 = arith.mulf %97, %98 : vector<1x128xf32>
    %100 = arith.mulf %95, %95 : vector<8x128xf32>
    %cst_51 = arith.constant dense<0.000000e+00> : vector<128xf32>
    %101 = vector.multi_reduction <add>, %100, %cst_51 [0] : vector<8x128xf32> to vector<128xf32>
    %102 = vector.shape_cast %101 : vector<128xf32> to vector<1x128xf32>
    %cst_52 = arith.constant 1.250000e-01 : f32
    %103 = vector.broadcast %cst_52 : f32 to vector<1x128xf32>
    %104 = arith.mulf %102, %103 : vector<1x128xf32>
    %105 = arith.mulf %99, %99 : vector<1x128xf32>
    %106 = arith.subf %104, %105 : vector<1x128xf32>
    %cst_53 = arith.constant 0.000000e+00 : f32
    %107 = vector.broadcast %cst_53 : f32 to vector<1x128xf32>
    %108 = arith.maximumf %106, %107 : vector<1x128xf32>
    %cst_54 = arith.constant 1.000000e-03 : f32
    %109 = vector.broadcast %cst_54 : f32 to vector<1x128xf32>
    %110 = arith.addf %108, %109 : vector<1x128xf32>
    %111 = math.rsqrt %110 : vector<1x128xf32>
    %112 = arith.mulf %111, %92 : vector<1x128xf32>
    %113 = arith.mulf %99, %112 : vector<1x128xf32>
    %114 = arith.subf %93, %113 : vector<1x128xf32>
    %115 = vector.broadcast %112 : vector<1x128xf32> to vector<8x128xf32>
    %116 = arith.mulf %95, %115 : vector<8x128xf32>
    %117 = vector.broadcast %114 : vector<1x128xf32> to vector<8x128xf32>
    %118 = arith.addf %116, %117 : vector<8x128xf32>
    %cst_55 = arith.constant 0.000000e+00 : f32
    %119 = vector.broadcast %cst_55 : f32 to vector<8x128xf32>
    %120 = arith.maximumf %118, %119 : vector<8x128xf32>
    %c0_56 = arith.constant 0 : index
    %c0_57 = arith.constant 0 : index
    %121 = vector.load %arg13[%c0_56, %c0_57] : memref<128x128xbf16, #tpu.memory_space<vmem>>, vector<128x128xbf16>
    %c0_58 = arith.constant 0 : index
    %c0_59 = arith.constant 0 : index
    %122 = vector.load %arg14[%c0_58, %c0_59] : memref<1x128xf32, #tpu.memory_space<vmem>>, vector<1x128xf32>
    %c0_60 = arith.constant 0 : index
    %c0_61 = arith.constant 0 : index
    %123 = vector.load %arg15[%c0_60, %c0_61] : memref<1x128xf32, #tpu.memory_space<vmem>>, vector<1x128xf32>
    %124 = arith.truncf %120 : vector<8x128xf32> to vector<8x128xbf16>
    %cst_62 = arith.constant dense<0.000000e+00> : vector<8x128xf32>
    %125 = tpu.matmul %124, %121, %cst_62 {dimension_numbers = #tpu.dot_dimension_numbers<[1], [0], [0], [1], [0, 0, 1, 1], [], []>} : vector<8x128xbf16>, vector<128x128xbf16>, vector<8x128xf32> -> vector<8x128xf32>
    %cst_63 = arith.constant dense<0.000000e+00> : vector<128xf32>
    %126 = vector.multi_reduction <add>, %125, %cst_63 [0] : vector<8x128xf32> to vector<128xf32>
    %127 = vector.shape_cast %126 : vector<128xf32> to vector<1x128xf32>
    %cst_64 = arith.constant 1.250000e-01 : f32
    %128 = vector.broadcast %cst_64 : f32 to vector<1x128xf32>
    %129 = arith.mulf %127, %128 : vector<1x128xf32>
    %130 = arith.mulf %125, %125 : vector<8x128xf32>
    %cst_65 = arith.constant dense<0.000000e+00> : vector<128xf32>
    %131 = vector.multi_reduction <add>, %130, %cst_65 [0] : vector<8x128xf32> to vector<128xf32>
    %132 = vector.shape_cast %131 : vector<128xf32> to vector<1x128xf32>
    %cst_66 = arith.constant 1.250000e-01 : f32
    %133 = vector.broadcast %cst_66 : f32 to vector<1x128xf32>
    %134 = arith.mulf %132, %133 : vector<1x128xf32>
    %135 = arith.mulf %129, %129 : vector<1x128xf32>
    %136 = arith.subf %134, %135 : vector<1x128xf32>
    %cst_67 = arith.constant 0.000000e+00 : f32
    %137 = vector.broadcast %cst_67 : f32 to vector<1x128xf32>
    %138 = arith.maximumf %136, %137 : vector<1x128xf32>
    %cst_68 = arith.constant 1.000000e-03 : f32
    %139 = vector.broadcast %cst_68 : f32 to vector<1x128xf32>
    %140 = arith.addf %138, %139 : vector<1x128xf32>
    %141 = math.rsqrt %140 : vector<1x128xf32>
    %142 = arith.mulf %141, %122 : vector<1x128xf32>
    %143 = arith.mulf %129, %142 : vector<1x128xf32>
    %144 = arith.subf %123, %143 : vector<1x128xf32>
    %145 = vector.broadcast %142 : vector<1x128xf32> to vector<8x128xf32>
    %146 = arith.mulf %125, %145 : vector<8x128xf32>
    %147 = vector.broadcast %144 : vector<1x128xf32> to vector<8x128xf32>
    %148 = arith.addf %146, %147 : vector<8x128xf32>
    %cst_69 = arith.constant 0.000000e+00 : f32
    %149 = vector.broadcast %cst_69 : f32 to vector<8x128xf32>
    %150 = arith.maximumf %148, %149 : vector<8x128xf32>
    %c0_70 = arith.constant 0 : index
    %c0_71 = arith.constant 0 : index
    %151 = vector.load %arg16[%c0_70, %c0_71] : memref<8x128xf32, #tpu.memory_space<vmem>>, vector<8x128xf32>
    tpu.vector_store %arg16[%c0_70, %c0_71], %150 {strides = array<i32>} : memref<8x128xf32, #tpu.memory_space<vmem>>, vector<8x128xf32>,
    return
  }
}

</mosaic_0001>

<bundles_post_ra>
// kernel: tpu_custom_call.1
= control target key start
LH: loop header
LB: loop body
LE: loop exit
PB: predicated region body
PF: predicated region fallthrough
CT: control target
= control target key end

     0   :  { %s1490_s0 = inlined_call_operand.hbm [shape: f32[8,128], index: 0, kind: input, shape index: {}]   ;;  %s1491_s1 = inlined_call_operand.hbm [shape: bf16[128,128], index: 1, kind: input, shape index: {}]   ;;  %s1492_s2 = inlined_call_operand.vmem [shape: f32[1,128], index: 2, kind: input, shape index: {}]   ;;  %s1493_s3 = inlined_call_operand.vmem [shape: f32[1,128], index: 3, kind: input, shape index: {}]   ;;  %s1494_s4 = inlined_call_operand.hbm [shape: bf16[128,128], index: 4, kind: input, shape index: {}]   ;;  %s1495_s5 = inlined_call_operand.vmem [shape: f32[1,128], index: 5, kind: input, shape index: {}]   ;;  %s1496_s6 = inlined_call_operand.vmem [shape: f32[1,128], index: 6, kind: input, shape index: {}]   ;;  %s1497_s7 = inlined_call_operand.hbm [shape: bf16[128,128], index: 7, kind: input, shape index: {}]   ;;  %s1498_s8 = inlined_call_operand.vmem [shape: f32[1,128], index: 8, kind: input, shape index: {}]   ;;  %s1499_s9 = inlined_call_operand.vmem [shape: f32[1,128], index: 9, kind: input, shape index: {}]   ;;  %s1500_s10 = inlined_call_operand.hbm [shape: bf16[128,128], index: 10, kind: input, shape index: {}]   ;;  %s1501_s11 = inlined_call_operand.vmem [shape: f32[1,128], index: 11, kind: input, shape index: {}]   ;;  %s1502_s12 = inlined_call_operand.vmem [shape: f32[1,128], index: 12, kind: input, shape index: {}]   ;;  %s1503_s13 = inlined_call_operand.hbm [shape: bf16[128,128], index: 13, kind: input, shape index: {}]   ;;  %s1504_s14 = inlined_call_operand.vmem [shape: f32[1,128], index: 14, kind: input, shape index: {}]   ;;  %s1505_s15 = inlined_call_operand.vmem [shape: f32[1,128], index: 15, kind: input, shape index: {}]   ;;  %s1506_s16 = inlined_call_operand.hbm [shape: f32[8,128], index: 16, kind: output, shape index: {}]  }
   0x1   :  { %1507 = sst [smem:[#allocation19_spill]] %s1490_s0 }
   0x2   :  { %21 = vsyncpa [#allocation3], 0 }
   0x3   :  { %22 = vsyncpa [#allocation6], 0 }
   0x4   :  { %23 = vsyncpa [#allocation9], 0 }
   0x5   :  { %24 = vsyncpa [#allocation12], 0 }
   0x6   :  { %25 = vsyncpa [#allocation4], 0  ;;  %s1266_s21 = smov [#allocation5]  }
   0x7   :  { %s41_s22 = sshll.u32 %s1266_s21, 4  ;;  %s42_s22 = int_to_ptr.vmem [resolvable:$true] %s41_s22 }
   0x8   :  { %s1124_s23 = scalar_lea.vmem %s42_s22, 1024  ;;  %p1129_p1 = scmp.lt.s32.totalorder %s42_s22, %s42_s22 }
   0x9   :  { %p1125_p0 = scmp.ne.s32.totalorder %s42_s22, %s1124_s23  ;;  %p1130_p2 = scmp.lt.s32.totalorder %s1124_s23, %s1124_s23 }
   0xb   :  { %p1131_p3 = por %p1130_p2, %p1129_p1 }
   0xd   :  { %p1132_p4 = pnand %p1131_p3, %p1125_p0 }
   0xf   :  { %1135 = shalt.err (!%p1132_p4)
}
  0x10   :  { %s1267_s24 = smov 64   ;;  %s1268_s25 = smov 4  }
  0x11   :  { %47 = dma.hbm_to_vmem [thread:$0]  %s1491_s1, 1024, %s42_s22, [#allocation6], %s1267_s24, %s1267_s24, %s1268_s25  }
  0x12   :  { %s1269_s28 = smov [#allocation8]   ;;  %s1270_s30 = smov [#allocation2]  }
  0x13   :  { %s73_s29 = sshll.u32 %s1269_s28, 4  ;;  %s32_s0 = sshll.u32 %s1270_s30, 4  ;;  %s74_s29 = int_to_ptr.vmem [resolvable:$true] %s73_s29  ;;  %s33_s0 = int_to_ptr.vmem [resolvable:$true] %s32_s0 }
  0x14   :  { %s1144_s17 = scalar_lea.vmem %s74_s29, 1024  ;;  %p1149_p6 = scmp.lt.s32.totalorder %s74_s29, %s74_s29 }
  0x15   :  { %p1145_p5 = scmp.ne.s32.totalorder %s74_s29, %s1144_s17  ;;  %p1150_p7 = scmp.lt.s32.totalorder %s1144_s17, %s1144_s17 }
  0x17   :  { %p1151_p8 = por %p1150_p7, %p1149_p6 }
  0x19   :  { %p1152_p9 = pnand %p1151_p8, %p1145_p5 }
  0x1b   :  { %1155 = shalt.err (!%p1152_p9)
}
  0x1c   :  { %79 = dma.hbm_to_vmem [thread:$0]  %s1497_s7, 1024, %s74_s29, [#allocation9], %s1267_s24, %s1267_s24, %s1268_s25  }
  0x1d   :  { %s1164_s1 = scalar_lea.vmem %s33_s0, 128  ;;  %p1169_p11 = scmp.lt.s32.totalorder %s33_s0, %s33_s0 }
  0x1e   :  { %p1165_p10 = scmp.ne.s32.totalorder %s33_s0, %s1164_s1  ;;  %p1170_p12 = scmp.lt.s32.totalorder %s1164_s1, %s1164_s1 }
  0x20   :  { %p1171_p13 = por %p1170_p12, %p1169_p11 }
  0x22   :  { %p1172_p0 = pnand %p1171_p13, %p1165_p10 }
  0x24   :  { %1175 = shalt.err (!%p1172_p0)
}
  0x25   :  { %s1508_s22 = sld [smem:[#allocation19_spill]]  ;;  %s1271_s23 = smov [#allocation7]  }
  0x26   :  { %s57_s26 = sshll.u32 %s1271_s23, 4  ;;  %s1272_s27 = smov [#allocation10]   ;;  %s58_s26 = int_to_ptr.vmem [resolvable:$true] %s57_s26 }
  0x27   :  { %s89_s28 = sshll.u32 %s1272_s27, 4  ;;  %s1184_s30 = scalar_lea.vmem %s58_s26, 1024  ;;  %s90_s28 = int_to_ptr.vmem [resolvable:$true] %s89_s28 }
  0x28   :  { %p1185_p1 = scmp.ne.s32.totalorder %s58_s26, %s1184_s30  ;;  %p1189_p2 = scmp.lt.s32.totalorder %s58_s26, %s58_s26 }
  0x29   :  { %p1190_p3 = scmp.lt.s32.totalorder %s1184_s30, %s1184_s30 }
  0x2b   :  { %35 = dma.hbm_to_vmem [thread:$0]  %s1508_s22, 128, %s33_s0, [#allocation3]  }
  0x2c   :  { %p1191_p4 = por %p1190_p3, %p1189_p2 }
  0x2e   :  { %p1192_p5 = pnand %p1191_p4, %p1185_p1 }
  0x30   :  { %1195 = shalt.err (!%p1192_p5)
}
  0x31   :  { %63 = dma.hbm_to_vmem [thread:$0]  %s1494_s4, 1024, %s58_s26, [#allocation6], %s1267_s24, %s1267_s24, %s1268_s25  }
  0x32   :  { %s1204_s0 = scalar_lea.vmem %s90_s28, 1024  ;;  %p1209_p7 = scmp.lt.s32.totalorder %s90_s28, %s90_s28 }
  0x33   :  { %p1205_p6 = scmp.ne.s32.totalorder %s90_s28, %s1204_s0  ;;  %p1210_p8 = scmp.lt.s32.totalorder %s1204_s0, %s1204_s0 }
  0x35   :  { %p1211_p9 = por %p1210_p8, %p1209_p7 }
  0x37   :  { %p1212_p10 = pnand %p1211_p9, %p1205_p6 }
  0x39   :  { %1215 = shalt.err (!%p1212_p10)
}
  0x3a   :  { %95 = dma.hbm_to_vmem [thread:$0]  %s1500_s10, 1024, %s90_s28, [#allocation9], %s1267_s24, %s1267_s24, %s1268_s25  }
  0x3b   :  { %s1273_s19 = smov [#allocation11]  }
  0x3c   :  { %s105_s1 = sshll.u32 %s1273_s19, 4  ;;  %s106_s1 = int_to_ptr.vmem [resolvable:$true] %s105_s1 }
  0x3d   :  { %s1224_s20 = scalar_lea.vmem %s106_s1, 1024  ;;  %p1229_p12 = scmp.lt.s32.totalorder %s106_s1, %s106_s1 }
  0x3e   :  { %p1225_p11 = scmp.ne.s32.totalorder %s106_s1, %s1224_s20  ;;  %p1230_p13 = scmp.lt.s32.totalorder %s1224_s20, %s1224_s20 }
  0x40   :  { %p1231_p0 = por %p1230_p13, %p1229_p12 }
  0x42   :  { %p1232_p1 = pnand %p1231_p0, %p1225_p11 }
  0x44   :  { %1235 = shalt.err (!%p1232_p1)
}
  0x45   :  { %111 = dma.hbm_to_vmem [thread:$0]  %s1503_s13, 1024, %s106_s1, [#allocation12], %s1267_s24, %s1267_s24, %s1268_s25  }
  0x46   :  { %1256 = dma.done.wait [#allocation3], 128  }
  0x47   :  { %1257 = vsyncadd [#allocation3], 4294967168 }
  0x48   :  { %1258 = dma.done.wait [#allocation6], 2048  }
  0x49   :  { %1259 = vsyncadd [#allocation6], 4294965248 }
  0x4a   :  { %1260 = dma.done.wait [#allocation9], 2048  }
  0x4b   :  { %1261 = vsyncadd [#allocation9], 4294965248 }
  0x4c   :  { %1262 = dma.done.wait [#allocation12], 1024  }
  0x4d   :  { %1263 = vsyncadd [#allocation12], 4294966272  ;;  %v1274_v0 = vmov 0.0   ;;  %vm1275_vm0 = vmmov 0   ;;  %v1066_v1 = vld [vmem:[#allocation5 + $0x38] sm:$0xff]   ;;  %v1067_v2 = vld [vmem:[#allocation5 + $0x30] sm:$0xff]   ;;  %v266_v42 = vlaneseq }
  0x4e   :  { %955 = vmatprep.subr.bf16.mxu0 %v1274_v0  ;;  %971 = vmatprep.mubr.msk.bf16.mxu0 %vm1275_vm0, %v1274_v0  ;;  %v1068_v3 = vld [vmem:[#allocation5 + $0x28] sm:$0xff]   ;;  %v1069_v4 = vld [vmem:[#allocation5 + $0x20] sm:$0xff]   ;;  %v1070_v5 = vld [vmem:[#allocation5 + $0x18] sm:$0xff]   ;;  %s1276_s0 = smov [#allocation13]  }
  0x4f   :  { %975 = vmatprep.subr.bf16.mxu1 %v1274_v0  ;;  %991 = vmatprep.mubr.msk.bf16.mxu1 %vm1275_vm0, %v1274_v0  ;;  %v1071_v6 = vld [vmem:[#allocation5 + $0x10] sm:$0xff]   ;;  %v1072_v7 = vld [vmem:[#allocation5 + $0x8] sm:$0xff]   ;;  %v1073_v8 = vld [vmem:[#allocation5] sm:$0xff]   ;;  %v267_v43 = vshrl.u32 %v266_v42, 7  ;;  %s858_s17 = sshll.u32 %s1276_s0, 4  ;;  %s859_s17 = int_to_ptr.vmem [resolvable:$true] %s858_s17 }
  0x50   :  { %956 = vmatpush3.bf16.msra.mxu0 %v1066_v1  ;;  %v135_v9 = vld [vmem:[#allocation2] sm:$0xff]  ;;  %v1075_v12 = vld [vmem:[#allocation7 + $0x30] sm:$0xff]   ;;  %v1076_v13 = vld [vmem:[#allocation7 + $0x28] sm:$0xff]   ;;  %p1241_p3 = scmp.lt.s32.totalorder %s859_s17, %s859_s17 }
  0x51   :  { %957 = vmatprep.subr.bf16.mxu0 %v1274_v0  ;;  %v154_v10 = vpack.c.bf16 %v135_v9, %v135_v9  ;;  %v1074_v11 = vld [vmem:[#allocation7 + $0x38] sm:$0xff]   ;;  %v1077_v14 = vld [vmem:[#allocation7 + $0x20] sm:$0xff]   ;;  %v1079_v16 = vld [vmem:[#allocation7 + $0x10] sm:$0xff]   ;;  %v1422_v45 = vsub.s32 0, %v267_v43 }
  0x52   :  { %976 = vmatpush3.bf16.msra.mxu1 %v1074_v11  ;;  %v1078_v15 = vld [vmem:[#allocation7 + $0x18] sm:$0xff]   ;;  %v1080_v17 = vld [vmem:[#allocation7 + $0x8] sm:$0xff]   ;;  %v1081_v18 = vld [vmem:[#allocation7] sm:$0xff]  }
  0x53   :  { %977 = vmatprep.subr.bf16.mxu1 %v1274_v0  ;;  %v152_v44 = vld [vmem:[%s1492_s2] sm:$0x1]  ;;  %v1083_v58 = vld [vmem:[#allocation8 + $0x30] sm:$0xff]   ;;  %v1084_v59 = vld [vmem:[#allocation8 + $0x28] sm:$0xff]  }
  0x54   :  { %958 = vmatpush3.bf16.msra.mxu0 %v1067_v2  ;;  %v153_v48 = vld [vmem:[%s1493_s3] sm:$0x1]  ;;  %v1085_v60 = vld [vmem:[#allocation8 + $0x20] sm:$0xff]   ;;  %v1087_v62 = vld [vmem:[#allocation8 + $0x10] sm:$0xff]  }
  0x55   :  { %959 = vmatprep.subr.bf16.mxu0 %v1274_v0  ;;  %v1082_v57 = vld [vmem:[#allocation8 + $0x38] sm:$0xff]   ;;  %v1088_v63 = vld [vmem:[#allocation8 + $0x8] sm:$0xff]   ;;  %v1089_v1 = vld [vmem:[#allocation8] sm:$0xff]  }
  0x56   :  { %978 = vmatpush3.bf16.msra.mxu1 %v1075_v12  ;;  %v1086_v61 = vld [vmem:[#allocation8 + $0x18] sm:$0xff]   ;;  %v1095_v42 = vld [vmem:[#allocation10 + $0x10] sm:$0xff]   ;;  %v1096_v43 = vld [vmem:[#allocation10 + $0x8] sm:$0xff]  }
  0x57   :  { %979 = vmatprep.subr.bf16.mxu1 %v1274_v0 }
  0x58   :  { %960 = vmatpush3.bf16.msra.mxu0 %v1068_v3 }
  0x59   :  { %961 = vmatprep.subr.bf16.mxu0 %v1274_v0 }
  0x5a   :  { %980 = vmatpush3.bf16.msra.mxu1 %v1076_v13 }
  0x5b   :  { %981 = vmatprep.subr.bf16.mxu1 %v1274_v0 }
  0x5c   :  { %962 = vmatpush3.bf16.msra.mxu0 %v1069_v4 }
  0x5d   :  { %963 = vmatprep.subr.bf16.mxu0 %v1274_v0 }
  0x5e   :  { %982 = vmatpush3.bf16.msra.mxu1 %v1077_v14 }
  0x5f   :  { %983 = vmatprep.subr.bf16.mxu1 %v1274_v0 }
  0x60   :  { %964 = vmatpush3.bf16.msra.mxu0 %v1070_v5 }
  0x61   :  { %965 = vmatprep.subr.bf16.mxu0 %v1274_v0 }
  0x62   :  { %984 = vmatpush3.bf16.msra.mxu1 %v1078_v15 }
  0x63   :  { %985 = vmatprep.subr.bf16.mxu1 %v1274_v0 }
  0x64   :  { %966 = vmatpush3.bf16.msra.mxu0 %v1071_v6 }
  0x65   :  { %967 = vmatprep.subr.bf16.mxu0 %v1274_v0 }
  0x66   :  { %986 = vmatpush3.bf16.msra.mxu1 %v1079_v16 }
  0x67   :  { %987 = vmatprep.subr.bf16.mxu1 %v1274_v0 }
  0x68   :  { %968 = vmatpush3.bf16.msra.mxu0 %v1072_v7 }
  0x69   :  { %969 = vmatprep.subr.bf16.mxu0 %v1274_v0 }
  0x6a   :  { %988 = vmatpush3.bf16.msra.mxu1 %v1080_v17 }
  0x6b   :  { %989 = vmatprep.subr.bf16.mxu1 %v1274_v0 }
  0x6c   :  { %970 = vmatpush3.bf16.msra.mxu0 %v1073_v8 }
  0x6d   :  { %995 = vmatprep.subr.bf16.mxu0 %v1274_v0 }
  0x6e   :  { %990 = vmatpush3.bf16.msra.mxu1 %v1081_v18 }
  0x6f   :  { %972 = vmatmul.mubr.bf16.vlgmr.msra.gmra.mxu0 %v154_v10  ;;  %1015 = vmatprep.subr.bf16.mxu1 %v1274_v0 }
  0x70   :  { %1011 = vmatprep.mubr.msk.bf16.mxu0 %vm1275_vm0, %v1274_v0  ;;  %996 = vmatpush3.bf16.msra.mxu0 %v1082_v57 }
  0x71   :  { %997 = vmatprep.subr.bf16.mxu0 %v1274_v0 }
  0x74   :  { %998 = vmatpush3.bf16.msra.mxu0 %v1083_v58 }
  0x75   :  { %999 = vmatprep.subr.bf16.mxu0 %v1274_v0 }
  0x78   :  { %1000 = vmatpush3.bf16.msra.mxu0 %v1084_v59 }
  0x79   :  { %1001 = vmatprep.subr.bf16.mxu0 %v1274_v0 }
  0x7c   :  { %1002 = vmatpush3.bf16.msra.mxu0 %v1085_v60 }
  0x7d   :  { %1003 = vmatprep.subr.bf16.mxu0 %v1274_v0 }
  0x80   :  { %1004 = vmatpush3.bf16.msra.mxu0 %v1086_v61 }
  0x81   :  { %1005 = vmatprep.subr.bf16.mxu0 %v1274_v0 }
  0x84   :  { %1006 = vmatpush3.bf16.msra.mxu0 %v1087_v62 }
  0x85   :  { %1007 = vmatprep.subr.bf16.mxu0 %v1274_v0 }
  0x88   :  { %1008 = vmatpush3.bf16.msra.mxu0 %v1088_v63 }
  0x89   :  { %1009 = vmatprep.subr.bf16.mxu0 %v1274_v0 }
  0x8c   :  { %1010 = vmatpush3.bf16.msra.mxu0 %v1089_v1 }
  0x8d   :  { %1035 = vmatprep.subr.bf16.mxu0 %v1274_v0 }
 0x12f   :  { %v237_v19 = vpop.f32.mrf.mxu0 }
 0x130   :  { %v243_v20 = vrot.slane %v237_v19, 4  ;;  %v250_v21 = vmul.f32 %v237_v19, %v237_v19 }
 0x131   :  { %v973_v22 = vpop.f32.mrf.mxu0 }
 0x132   :  { %v244_v23 = vadd.f32 %v243_v20, %v237_v19  ;;  %v251_v24 = vrot.slane %v250_v21, 4 }
 0x133   :  { %v240_v25 = vpop.f32.mrf.mxu0 }
 0x134   :  { %v245_v26 = vrot.slane %v244_v23, 2  ;;  %v252_v27 = vadd.f32 %v251_v24, %v250_v21  ;;  %v295_v25 = vld [vmem:[%s1495_s5] sm:$0x1] }
 0x135   :  { %v974_v28 = vpop.f32.mrf.mxu0 }
 0x136   :  { %v246_v29 = vadd.f32 %v245_v26, %v244_v23  ;;  %v253_v30 = vrot.slane %v252_v27, 2  ;;  %v296_v28 = vld [vmem:[%s1496_s6] sm:$0x1] }
 0x138   :  { %v247_v31 = vrot.slane %v246_v29, 1  ;;  %v254_v32 = vadd.f32 %v253_v30, %v252_v27 }
 0x13a   :  { %v248_v33 = vadd.f32 %v247_v31, %v246_v29  ;;  %v255_v34 = vrot.slane %v254_v32, 1 }
 0x13c   :  { %v249_v35 = vmul.f32 0.125, %v248_v33  ;;  %v256_v36 = vadd.f32 %v255_v34, %v254_v32 }
 0x13e   :  { %v257_v37 = vmul.f32 0.125, %v256_v36  ;;  %v258_v38 = vmul.f32 %v249_v35, %v249_v35 }
 0x140   :  { %v259_v39 = vsub.f32 %v257_v37, %v258_v38  ;;  %v1090_v37 = vld [vmem:[#allocation10 + $0x38] sm:$0xff]   ;;  %v1091_v38 = vld [vmem:[#allocation10 + $0x30] sm:$0xff]  }
 0x142   :  { %v260_v40 = vmax.f32 %v259_v39, 0.0  ;;  %v1092_v39 = vld [vmem:[#allocation10 + $0x28] sm:$0xff]  }
 0x144   :  { %v261_v41 = vadd.f32 0.001, %v260_v40  ;;  %v1093_v40 = vld [vmem:[#allocation10 + $0x20] sm:$0xff]  }
 0x146   :  { %1106 = vrsqrt.f32 %v261_v41  ;;  %v1094_v41 = vld [vmem:[#allocation10 + $0x18] sm:$0xff]  }
 0x153   :  { %v1107_v46 = vpop.eup %1106 }
 0x154   :  { %v263_v47 = vmul.f32 %v1107_v46, %v152_v44  ;;  %v1097_v44 = vld [vmem:[#allocation10] sm:$0xff]  }
 0x156   :  { %v269_v49 = vrot.slane %v263_v47, %v1422_v45  ;;  %v264_v50 = vmul.f32 %v263_v47, %v249_v35 }
 0x158   :  { %v265_v51 = vsub.f32 %v153_v48, %v264_v50  ;;  %v270_v52 = vmul.f32 %v269_v49, %v237_v19 }
 0x15a   :  { %v275_v53 = vrot.slane %v265_v51, %v1422_v45 }
 0x15c   :  { %v277_v54 = vadd.f32 %v275_v53, %v270_v52 }
 0x15e   :  { %v278_v55 = vmax.f32 %v277_v54, 0.0 }
 0x160   :  { %v297_v56 = vpack.c.bf16 %v278_v55, %v278_v55 }
 0x162   :  { %992 = vmatmul.mubr.bf16.vlgmr.msra.gmra.mxu1 %v297_v56 }
 0x163   :  { %1031 = vmatprep.mubr.msk.bf16.mxu1 %vm1275_vm0, %v1274_v0  ;;  %1016 = vmatpush3.bf16.msra.mxu1 %v1090_v37 }
 0x164   :  { %1017 = vmatprep.subr.bf16.mxu1 %v1274_v0 }
 0x167   :  { %1018 = vmatpush3.bf16.msra.mxu1 %v1091_v38 }
 0x168   :  { %1019 = vmatprep.subr.bf16.mxu1 %v1274_v0 }
 0x16b   :  { %1020 = vmatpush3.bf16.msra.mxu1 %v1092_v39 }
 0x16c   :  { %1021 = vmatprep.subr.bf16.mxu1 %v1274_v0 }
 0x16f   :  { %1022 = vmatpush3.bf16.msra.mxu1 %v1093_v40 }
 0x170   :  { %1023 = vmatprep.subr.bf16.mxu1 %v1274_v0 }
 0x173   :  { %1024 = vmatpush3.bf16.msra.mxu1 %v1094_v41 }
 0x174   :  { %1025 = vmatprep.subr.bf16.mxu1 %v1274_v0 }
 0x177   :  { %1026 = vmatpush3.bf16.msra.mxu1 %v1095_v42 }
 0x178   :  { %1027 = vmatprep.subr.bf16.mxu1 %v1274_v0 }
 0x17b   :  { %1028 = vmatpush3.bf16.msra.mxu1 %v1096_v43 }
 0x17c   :  { %1029 = vmatprep.subr.bf16.mxu1 %v1274_v0 }
 0x17f   :  { %1030 = vmatpush3.bf16.msra.mxu1 %v1097_v44 }
 0x222   :  { %v380_v2 = vpop.f32.mrf.mxu1 }
 0x223   :  { %v386_v3 = vrot.slane %v380_v2, 4  ;;  %v393_v4 = vmul.f32 %v380_v2, %v380_v2 }
 0x224   :  { %v993_v5 = vpop.f32.mrf.mxu1 }
 0x225   :  { %v387_v6 = vadd.f32 %v386_v3, %v380_v2  ;;  %v394_v7 = vrot.slane %v393_v4, 4 }
 0x226   :  { %v383_v8 = vpop.f32.mrf.mxu1 }
 0x227   :  { %v388_v9 = vrot.slane %v387_v6, 2  ;;  %v395_v10 = vadd.f32 %v394_v7, %v393_v4 }
 0x228   :  { %v994_v11 = vpop.f32.mrf.mxu1 }
 0x229   :  { %v389_v12 = vadd.f32 %v388_v9, %v387_v6  ;;  %v396_v13 = vrot.slane %v395_v10, 2  ;;  %v438_v6 = vld [vmem:[%s1498_s8] sm:$0x1] }
 0x22a   :  { %v439_v9 = vld [vmem:[%s1499_s9] sm:$0x1] }
 0x22b   :  { %v390_v14 = vrot.slane %v389_v12, 1  ;;  %v397_v15 = vadd.f32 %v396_v13, %v395_v10 }
 0x22d   :  { %v391_v16 = vadd.f32 %v390_v14, %v389_v12  ;;  %v398_v17 = vrot.slane %v397_v15, 1 }
 0x22f   :  { %v392_v18 = vmul.f32 0.125, %v391_v16  ;;  %v399_v19 = vadd.f32 %v398_v17, %v397_v15 }
 0x231   :  { %v400_v20 = vmul.f32 0.125, %v399_v19  ;;  %v401_v21 = vmul.f32 %v392_v18, %v392_v18  ;;  %v1099_v19 = vld [vmem:[#allocation11 + $0x30] sm:$0xff]  }
 0x233   :  { %v402_v22 = vsub.f32 %v400_v20, %v401_v21  ;;  %v1100_v20 = vld [vmem:[#allocation11 + $0x28] sm:$0xff]   ;;  %v1101_v21 = vld [vmem:[#allocation11 + $0x20] sm:$0xff]  }
 0x235   :  { %v403_v23 = vmax.f32 %v402_v22, 0.0  ;;  %v1102_v22 = vld [vmem:[#allocation11 + $0x18] sm:$0xff]  }
 0x237   :  { %v404_v24 = vadd.f32 0.001, %v403_v23  ;;  %v1103_v23 = vld [vmem:[#allocation11 + $0x10] sm:$0xff]  }
 0x239   :  { %1108 = vrsqrt.f32 %v404_v24  ;;  %v1104_v24 = vld [vmem:[#allocation11 + $0x8] sm:$0xff]  }
 0x246   :  { %v1109_v26 = vpop.eup %1108 }
 0x247   :  { %v406_v27 = vmul.f32 %v1109_v26, %v295_v25  ;;  %v1105_v25 = vld [vmem:[#allocation11] sm:$0xff]  }
 0x249   :  { %v407_v29 = vmul.f32 %v406_v27, %v392_v18  ;;  %v412_v30 = vrot.slane %v406_v27, %v1422_v45  ;;  %v1098_v18 = vld [vmem:[#allocation11 + $0x38] sm:$0xff]  }
 0x24b   :  { %v408_v31 = vsub.f32 %v296_v28, %v407_v29  ;;  %v413_v32 = vmul.f32 %v412_v30, %v380_v2 }
 0x24d   :  { %v418_v33 = vrot.slane %v408_v31, %v1422_v45 }
 0x24f   :  { %v420_v34 = vadd.f32 %v418_v33, %v413_v32 }
 0x251   :  { %v421_v35 = vmax.f32 %v420_v34, 0.0 }
 0x253   :  { %v440_v36 = vpack.c.bf16 %v421_v35, %v421_v35 }
 0x255   :  { %1012 = vmatmul.mubr.bf16.vlgmr.msra.gmra.mxu0 %v440_v36 }
 0x256   :  { %1051 = vmatprep.mubr.msk.bf16.mxu0 %vm1275_vm0, %v1274_v0  ;;  %1036 = vmatpush3.bf16.msra.mxu0 %v1098_v18 }
 0x257   :  { %1037 = vmatprep.subr.bf16.mxu0 %v1274_v0 }
 0x25a   :  { %1038 = vmatpush3.bf16.msra.mxu0 %v1099_v19 }
 0x25b   :  { %1039 = vmatprep.subr.bf16.mxu0 %v1274_v0 }
 0x25e   :  { %1040 = vmatpush3.bf16.msra.mxu0 %v1100_v20 }
 0x25f   :  { %1041 = vmatprep.subr.bf16.mxu0 %v1274_v0 }
 0x262   :  { %1042 = vmatpush3.bf16.msra.mxu0 %v1101_v21  ;;  %v724_v21 = vld [vmem:[%s1504_s14] sm:$0x1]  ;;  %s1236_s14 = scalar_lea.vmem %s859_s17, 128 }
 0x263   :  { %1043 = vmatprep.subr.bf16.mxu0 %v1274_v0  ;;  %p1237_p2 = scmp.ne.s32.totalorder %s859_s17, %s1236_s14  ;;  %p1242_p4 = scmp.lt.s32.totalorder %s1236_s14, %s1236_s14 }
 0x265   :  { %p1243_p5 = por %p1242_p4, %p1241_p3 }
 0x266   :  { %1044 = vmatpush3.bf16.msra.mxu0 %v1102_v22 }
 0x267   :  { %1045 = vmatprep.subr.bf16.mxu0 %v1274_v0  ;;  %p1244_p6 = pnand %p1243_p5, %p1237_p2 }
 0x26a   :  { %1046 = vmatpush3.bf16.msra.mxu0 %v1103_v23 }
 0x26b   :  { %1047 = vmatprep.subr.bf16.mxu0 %v1274_v0 }
 0x26e   :  { %1048 = vmatpush3.bf16.msra.mxu0 %v1104_v24  ;;  %v725_v24 = vld [vmem:[%s1505_s15] sm:$0x1] }
 0x26f   :  { %1049 = vmatprep.subr.bf16.mxu0 %v1274_v0 }
 0x272   :  { %1050 = vmatpush3.bf16.msra.mxu0 %v1105_v25 }
 0x315   :  { %v523_v46 = vpop.f32.mrf.mxu0 }
 0x316   :  { %v529_v47 = vrot.slane %v523_v46, 4  ;;  %v536_v48 = vmul.f32 %v523_v46, %v523_v46 }
 0x317   :  { %v1013_v49 = vpop.f32.mrf.mxu0 }
 0x318   :  { %v530_v50 = vadd.f32 %v529_v47, %v523_v46  ;;  %v537_v51 = vrot.slane %v536_v48, 4  ;;  %v581_v49 = vld [vmem:[%s1501_s11] sm:$0x1] }
 0x319   :  { %v526_v52 = vpop.f32.mrf.mxu0 }
 0x31a   :  { %v531_v53 = vrot.slane %v530_v50, 2  ;;  %v538_v54 = vadd.f32 %v537_v51, %v536_v48  ;;  %v582_v52 = vld [vmem:[%s1502_s12] sm:$0x1] }
 0x31b   :  { %v1014_v55 = vpop.f32.mrf.mxu0 }
 0x31c   :  { %v532_v56 = vadd.f32 %v531_v53, %v530_v50  ;;  %v539_v57 = vrot.slane %v538_v54, 2 }
 0x31e   :  { %v533_v58 = vrot.slane %v532_v56, 1  ;;  %v540_v59 = vadd.f32 %v539_v57, %v538_v54 }
 0x320   :  { %v534_v60 = vadd.f32 %v533_v58, %v532_v56  ;;  %v541_v61 = vrot.slane %v540_v59, 1 }
 0x322   :  { %v535_v62 = vmul.f32 0.125, %v534_v60  ;;  %v542_v63 = vadd.f32 %v541_v61, %v540_v59 }
 0x324   :  { %v543_v1 = vmul.f32 0.125, %v542_v63  ;;  %v544_v2 = vmul.f32 %v535_v62, %v535_v62 }
 0x326   :  { %v545_v3 = vsub.f32 %v543_v1, %v544_v2 }
 0x328   :  { %v546_v4 = vmax.f32 %v545_v3, 0.0 }
 0x32a   :  { %v547_v5 = vadd.f32 0.001, %v546_v4 }
 0x32c   :  { %1110 = vrsqrt.f32 %v547_v5 }
 0x339   :  { %v1111_v7 = vpop.eup %1110 }
 0x33a   :  { %v549_v8 = vmul.f32 %v1111_v7, %v438_v6 }
 0x33c   :  { %v550_v10 = vmul.f32 %v549_v8, %v535_v62  ;;  %v555_v11 = vrot.slane %v549_v8, %v1422_v45 }
 0x33e   :  { %v551_v12 = vsub.f32 %v439_v9, %v550_v10  ;;  %v556_v13 = vmul.f32 %v555_v11, %v523_v46 }
 0x340   :  { %v561_v14 = vrot.slane %v551_v12, %v1422_v45 }
 0x342   :  { %v563_v15 = vadd.f32 %v561_v14, %v556_v13 }
 0x344   :  { %v564_v16 = vmax.f32 %v563_v15, 0.0 }
 0x346   :  { %v583_v17 = vpack.c.bf16 %v564_v16, %v564_v16 }
 0x348   :  { %1032 = vmatmul.mubr.bf16.vlgmr.msra.gmra.mxu1 %v583_v17 }
 0x408   :  { %v666_v26 = vpop.f32.mrf.mxu1 }
 0x409   :  { %v672_v27 = vrot.slane %v666_v26, 4  ;;  %v679_v28 = vmul.f32 %v666_v26, %v666_v26 }
 0x40a   :  { %v1033_v29 = vpop.f32.mrf.mxu1 }
 0x40b   :  { %v673_v30 = vadd.f32 %v672_v27, %v666_v26  ;;  %v680_v31 = vrot.slane %v679_v28, 4 }
 0x40c   :  { %v669_v32 = vpop.f32.mrf.mxu1 }
 0x40d   :  { %v674_v33 = vrot.slane %v673_v30, 2  ;;  %v681_v34 = vadd.f32 %v680_v31, %v679_v28 }
 0x40e   :  { %v1034_v35 = vpop.f32.mrf.mxu1 }
 0x40f   :  { %v675_v36 = vadd.f32 %v674_v33, %v673_v30  ;;  %v682_v37 = vrot.slane %v681_v34, 2 }
 0x411   :  { %v676_v38 = vrot.slane %v675_v36, 1  ;;  %v683_v39 = vadd.f32 %v682_v37, %v681_v34 }
 0x413   :  { %v677_v40 = vadd.f32 %v676_v38, %v675_v36  ;;  %v684_v41 = vrot.slane %v683_v39, 1 }
 0x415   :  { %v678_v42 = vmul.f32 0.125, %v677_v40  ;;  %v685_v0 = vadd.f32 %v684_v41, %v683_v39 }
 0x417   :  { %v686_v43 = vmul.f32 0.125, %v685_v0  ;;  %v687_v44 = vmul.f32 %v678_v42, %v678_v42 }
 0x419   :  { %v688_v46 = vsub.f32 %v686_v43, %v687_v44 }
 0x41b   :  { %v689_v47 = vmax.f32 %v688_v46, 0.0 }
 0x41d   :  { %v690_v48 = vadd.f32 0.001, %v689_v47 }
 0x41f   :  { %1112 = vrsqrt.f32 %v690_v48 }
 0x42c   :  { %v1113_v50 = vpop.eup %1112 }
 0x42d   :  { %v692_v51 = vmul.f32 %v1113_v50, %v581_v49 }
 0x42f   :  { %v693_v53 = vmul.f32 %v692_v51, %v678_v42  ;;  %v698_v54 = vrot.slane %v692_v51, %v1422_v45 }
 0x431   :  { %v694_v55 = vsub.f32 %v582_v52, %v693_v53  ;;  %v699_v56 = vmul.f32 %v698_v54, %v666_v26 }
 0x433   :  { %v704_v57 = vrot.slane %v694_v55, %v1422_v45 }
 0x435   :  { %v706_v58 = vadd.f32 %v704_v57, %v699_v56 }
 0x437   :  { %v707_v59 = vmax.f32 %v706_v58, 0.0 }
 0x439   :  { %v726_v60 = vpack.c.bf16 %v707_v59, %v707_v59 }
 0x43b   :  { %1052 = vmatmul.mubr.bf16.vlgmr.msra.gmra.mxu0 %v726_v60 }
 0x4fb   :  { %v809_v61 = vpop.f32.mrf.mxu0 }
 0x4fc   :  { %v815_v62 = vrot.slane %v809_v61, 4  ;;  %v822_v63 = vmul.f32 %v809_v61, %v809_v61 }
 0x4fd   :  { %v1053_v1 = vpop.f32.mrf.mxu0 }
 0x4fe   :  { %v816_v2 = vadd.f32 %v815_v62, %v809_v61  ;;  %v823_v3 = vrot.slane %v822_v63, 4 }
 0x4ff   :  { %v812_v4 = vpop.f32.mrf.mxu0 }
 0x500   :  { %v817_v5 = vrot.slane %v816_v2, 2  ;;  %v824_v6 = vadd.f32 %v823_v3, %v822_v63 }
 0x501   :  { %v1054_v7 = vpop.f32.mrf.mxu0 }
 0x502   :  { %v818_v8 = vadd.f32 %v817_v5, %v816_v2  ;;  %v825_v9 = vrot.slane %v824_v6, 2 }
 0x504   :  { %v819_v10 = vrot.slane %v818_v8, 1  ;;  %v826_v11 = vadd.f32 %v825_v9, %v824_v6 }
 0x506   :  { %v820_v12 = vadd.f32 %v819_v10, %v818_v8  ;;  %v827_v13 = vrot.slane %v826_v11, 1 }
 0x508   :  { %v821_v14 = vmul.f32 0.125, %v820_v12  ;;  %v828_v15 = vadd.f32 %v827_v13, %v826_v11 }
 0x50a   :  { %v829_v16 = vmul.f32 0.125, %v828_v15  ;;  %v830_v17 = vmul.f32 %v821_v14, %v821_v14 }
 0x50c   :  { %v831_v18 = vsub.f32 %v829_v16, %v830_v17 }
 0x50e   :  { %v832_v19 = vmax.f32 %v831_v18, 0.0 }
 0x510   :  { %v833_v20 = vadd.f32 0.001, %v832_v19 }
 0x512   :  { %1114 = vrsqrt.f32 %v833_v20 }
 0x51f   :  { %v1115_v22 = vpop.eup %1114 }
 0x520   :  { %v835_v23 = vmul.f32 %v1115_v22, %v724_v21 }
 0x522   :  { %v841_v25 = vrot.slane %v835_v23, %v1422_v45  ;;  %v836_v26 = vmul.f32 %v835_v23, %v821_v14 }
 0x524   :  { %v837_v27 = vsub.f32 %v725_v24, %v836_v26  ;;  %v842_v28 = vmul.f32 %v841_v25, %v809_v61 }
 0x526   :  { %v847_v29 = vrot.slane %v837_v27, %v1422_v45 }
 0x528   :  { %v849_v30 = vadd.f32 %v847_v29, %v842_v28 }
 0x52a   :  { %v850_v31 = vmax.f32 %v849_v30, 0.0 }
 0x52c   :  { %851 = vst [vmem:[#allocation13] sm:$0xff] %v850_v31 }
 0x52d   :  { %1247 = shalt.err (!%p1244_p6)
}
 0x52e   :  { %861 = dma.vmem_to_hbm [thread:$0]  %s859_s17, 128, %s1506_s16, [#allocation4]  }
 0x52f   :  { %1264 = dma.done.wait [#allocation4], 128  }
 0x530   :  { %1265 = vsyncadd [#allocation4], 4294967168 }
 0x531   :  { %865 = vsyncpa [#allocation3], 1 }
 0x532   :  { %866 = vsyncpa [#allocation6], 1 }
 0x533   :  { %867 = vsyncpa [#allocation9], 1 }
 0x534   :  { %868 = vsyncpa [#allocation12], 1 }
 0x535   :  { %869 = vsyncpa [#allocation4], 1 }

</bundles_post_ra>
